<compile_context>
chip_gen: v6e
topology: v6e:2x2x1
jax: 0.10.0
libtpu: 0.0.40
codegen_flags: <defaults>
</compile_context>

<pallas_src>
import functools

import jax
import jax.numpy as jnp
from jax.experimental import pallas as pl
from jax.experimental.pallas import tpu as pltpu


def _round_up(x, m):
    return (x + m - 1) // m * m


# ---------------------------------------------------------------------------
# Kernel 1: per-layer node transform   hl = h @ Wl + bl ,  hr = h @ Wr + br
# (row-tiled over nodes; weights VMEM-resident; bf16 MXU operands, f32 acc)
# ---------------------------------------------------------------------------
def _transform_kernel(h_ref, wl_ref, bl_ref, wr_ref, br_ref, hl_ref, hr_ref):
    h = h_ref[...].astype(jnp.bfloat16)           # bf16 MXU operands
    hl_ref[...] = jnp.dot(h, wl_ref[...],
                          preferred_element_type=jnp.float32) + bl_ref[...]
    hr_ref[...] = jnp.dot(h, wr_ref[...],
                          preferred_element_type=jnp.float32) + br_ref[...]


# ---------------------------------------------------------------------------
# Kernel 2: dense masked GATv2 attention for one tile of target nodes.
# (target-row-tiled; full hl table + attention vector VMEM-resident)
# ---------------------------------------------------------------------------
def _attention_kernel(hr_ref, hl_ref, adj_ref, a_ref, bo_ref, o_ref, *,
                      neg_slope, apply_relu):
    hr = hr_ref[...]                              # (TN, C) f32  target tile
    hl = hl_ref[...]                              # (N,  C) f32  all sources
    a = a_ref[...].reshape(1, 1, -1)              # (1, 1, C)

    z = hr[:, None, :] + hl[None, :, :]           # (TN, N, C)
    z = jnp.where(z >= 0, z, neg_slope * z)       # LeakyReLU(0.2)
    e = jnp.sum(z * a, axis=-1)                   # (TN, N) attention logits

    e = jnp.where(adj_ref[...] > 0.5, e, -1e30)   # mask non-edges
    e = e - jnp.max(e, axis=-1, keepdims=True)    # row-stable softmax
    p = jnp.exp(e)
    alpha = p / jnp.sum(p, axis=-1, keepdims=True)

    out = jnp.dot(alpha, hl, preferred_element_type=jnp.float32) + bo_ref[...]
    if apply_relu:                                # ReLU between layers only
        out = jnp.maximum(out, 0.0)
    o_ref[...] = out


# ---------------------------------------------------------------------------
# One GATv2 layer = transform kernel + attention kernel (both "parallel" grid)
# ---------------------------------------------------------------------------
def _gatv2_layer(h, adj, wl, bl, wr, br, a, bo, *, tile_n, neg_slope,
                 apply_relu):
    n_pad, f_in = h.shape
    c = wl.shape[1]
    grid = (n_pad // tile_n,)
    parallel = pltpu.CompilerParams(dimension_semantics=("parallel",))

    def resident(shape):                          # same block every step
        return pl.BlockSpec(shape, lambda i: (0,) * len(shape))

    def row_tile(last):                           # tile over node rows
        return pl.BlockSpec((tile_n, last), lambda i: (i, 0))

    hl, hr = pl.pallas_call(
        _transform_kernel,
        out_shape=(jax.ShapeDtypeStruct((n_pad, c), jnp.float32),
                   jax.ShapeDtypeStruct((n_pad, c), jnp.float32)),
        grid=grid,
        in_specs=[row_tile(f_in),                 # h rows (streamed)
                  resident((f_in, c)), resident((1, c)),   # Wl, bl (resident)
                  resident((f_in, c)), resident((1, c))],  # Wr, br (resident)
        out_specs=(row_tile(c), row_tile(c)),
        compiler_params=parallel,
    )(h, wl, bl, wr, br)

    out = pl.pallas_call(
        functools.partial(_attention_kernel, neg_slope=neg_slope,
                          apply_relu=apply_relu),
        out_shape=jax.ShapeDtypeStruct((n_pad, c), jnp.float32),
        grid=grid,
        in_specs=[row_tile(c),                    # hr: this tile of targets
                  resident((n_pad, c)),           # hl: all sources, resident
                  row_tile(n_pad),                # adjacency rows for the tile
                  resident((1, c)),               # attention vector a
                  resident((1, c))],              # output bias
        out_specs=row_tile(c),
        compiler_params=parallel,
    )(hr, hl, adj, a, bo)
    return out


# ---------------------------------------------------------------------------
# Full GatFCM GAT stack
# ---------------------------------------------------------------------------
def gatfcm_gat_forward(x, edge_index, params, *, tile_n=256, neg_slope=0.2):
    """x: (N, 480) concatenated node features; edge_index: (2, E) int32.
    params: output of prepare_params (bf16 weights, f32 biases/att)."""
    assert tile_n % 8 == 0
    n, f = x.shape
    tn = min(tile_n, _round_up(n, 8))
    n_pad = _round_up(n, tn)

    # Dense adjacency mask adj[target i, source j], with self-loops
    # (GATv2Conv add_self_loops=True; also keeps padded rows well-defined).
    adj = jnp.zeros((n_pad, n_pad), jnp.float32)
    adj = adj.at[edge_index[1], edge_index[0]].set(1.0)
    diag = jnp.arange(n_pad)
    adj = adj.at[diag, diag].set(1.0)

    # Pad nodes to the tile multiple and features to the padded layer-0 width.
    f0 = params[0][0].shape[0]
    h = jnp.zeros((n_pad, f0), jnp.float32).at[:n, :f].set(x)

    num_layers = len(params)
    for l, (wl, bl, wr, br, a, bo) in enumerate(params):
        h = _gatv2_layer(h, adj, wl, bl, wr, br, a, bo, tile_n=tn,
                         neg_slope=neg_slope,
                         apply_relu=(l < num_layers - 1))
    return h[:n]


# ---------------------------------------------------------------------------
# Parameters (PyG GATv2Conv layout, heads=1) + one-time offline prep
# ---------------------------------------------------------------------------
def init_params(key, in_dim, hidden_dim, out_dim, num_layers):
    """Per layer: (W_l (in,out), b_l (1,out), W_r (in,out), b_r (1,out),
    att (1,out), bias (1,out)) in float32."""
    dims = [in_dim] + [hidden_dim] * (num_layers - 1) + [out_dim]
    keys = jax.random.split(key, 6 * num_layers)
    params = []
    for l in range(num_layers):
        d_in, d_out = dims[l], dims[l + 1]
        k = keys[6 * l:6 * l + 6]
        s_w = d_in ** -0.5
        params.append((
            jax.random.normal(k[0], (d_in, d_out), jnp.float32) * s_w,
            jax.random.normal(k[1], (1, d_out), jnp.float32) * 0.01,
            jax.random.normal(k[2], (d_in, d_out), jnp.float32) * s_w,
            jax.random.normal(k[3], (1, d_out), jnp.float32) * 0.01,
            jax.random.normal(k[4], (1, d_out), jnp.float32) * d_out ** -0.5,
            jax.random.normal(k[5], (1, d_out), jnp.float32) * 0.01,
        ))
    return params


def prepare_params(raw_params):
    """One-time offline prep (NOT per call): pad the 480-wide layer-0 input
    dim to 512 so the first matmul's K is 128-aligned, and store matmul
    weights as bf16 (halves weight DMA, matches MXU bf16 peak)."""
    prepped = []
    for l, (wl, bl, wr, br, a, bo) in enumerate(raw_params):
        if l == 0:
            k_pad = _round_up(wl.shape[0], 128)
            pad = ((0, k_pad - wl.shape[0]), (0, 0))
            wl, wr = jnp.pad(wl, pad), jnp.pad(wr, pad)
        prepped.append((wl.astype(jnp.bfloat16), bl,
                        wr.astype(jnp.bfloat16), br, a, bo))
    return prepped


# ---------------------------------------------------------------------------
# Pure-JAX f32 reference (mirrors PyG GATv2Conv / GAT in eval mode)
# ---------------------------------------------------------------------------
def reference_forward(x, edge_index, raw_params, *, neg_slope=0.2):
    n = x.shape[0]
    adj = jnp.zeros((n, n), jnp.float32)
    adj = adj.at[edge_index[1], edge_index[0]].set(1.0)
    diag = jnp.arange(n)
    adj = adj.at[diag, diag].set(1.0)
    h = x
    num_layers = len(raw_params)
    for l, (wl, bl, wr, br, a, bo) in enumerate(raw_params):
        hl = h @ wl + bl
        hr = h @ wr + br
        z = hr[:, None, :] + hl[None, :, :]
        z = jnp.where(z >= 0, z, neg_slope * z)
        e = jnp.sum(z * a[0], axis=-1)
        e = jnp.where(adj > 0.5, e, -1e30)
        e = e - jnp.max(e, axis=-1, keepdims=True)
        p = jnp.exp(e)
        alpha = p / jnp.sum(p, axis=-1, keepdims=True)
        h = alpha @ hl + bo
        if l < num_layers - 1:
            h = jnp.maximum(h, 0.0)
    return h


if __name__ == "__main__":
    # hyper ~= {'gat_hidden_size': 128, 'gat_layers': 2, 'postcomb_dim': 128}
    #   -> GAT(480 -> 128 -> 64), inference mode.
    N, IN_DIM, HIDDEN, OUT, LAYERS = 48, 480, 128, 64, 2
    NUM_CONTACTS = 64

    key = jax.random.PRNGKey(0)
    kx, ke1, ke2, kp = jax.random.split(key, 4)

    # Stand-in for X = cat(per-protein node embeddings): (N, 480).
    x = jax.random.normal(kx, (N, IN_DIM), jnp.float32)

    # Stand-in for the contact-graph edge list (symmetric contacts), already
    # offset per graph as in GatFCM.forward: edge_index (2, E).
    src = jax.random.randint(ke1, (NUM_CONTACTS,), 0, N, dtype=jnp.int32)
    dst = jax.random.randint(ke2, (NUM_CONTACTS,), 0, N, dtype=jnp.int32)
    edge_index = jnp.stack([jnp.concatenate([src, dst]),
                            jnp.concatenate([dst, src])])

    raw_params = init_params(kp, IN_DIM, HIDDEN, OUT, LAYERS)
    params = prepare_params(raw_params)          # offline: bf16 + K-padding

    # tile_n=16 keeps the demo tiny but still exercises a multi-step
    # "parallel" node grid (48 / 16 = 3 steps); use 128-256 in production.
    out = gatfcm_gat_forward(x, edge_index, params, tile_n=16)
    out = jax.block_until_ready(out)

    ref = reference_forward(x, edge_index, raw_params)
    assert out.shape == (N, OUT), out.shape
    max_err = float(jnp.max(jnp.abs(out - ref)))
    assert jnp.allclose(out, ref, atol=5e-2, rtol=5e-2), max_err  # bf16 matmuls

    print("KERNEL_OK")
</pallas_src>

<mosaic_0001>
module attributes {stable_mosaic.version = 11 : i64} {
  func.func @_transform_kernel(%arg0: i32, %arg1: memref<16x512xf32, #tpu.memory_space<vmem>>, %arg2: memref<512x128xbf16, #tpu.memory_space<vmem>>, %arg3: memref<1x128xf32, #tpu.memory_space<vmem>>, %arg4: memref<512x128xbf16, #tpu.memory_space<vmem>>, %arg5: memref<1x128xf32, #tpu.memory_space<vmem>>, %arg6: memref<16x128xf32, #tpu.memory_space<vmem>>, %arg7: memref<16x128xf32, #tpu.memory_space<vmem>>) attributes {dimension_semantics = [#tpu.dimension_semantics<parallel>], iteration_bounds = array<i64: 3>, scalar_prefetch = 0 : i64, scratch_operands = 0 : i64, tpu.core_type = #tpu.core_type<tc>, window_params = [{transform_indices = @transform_0, window_bounds = array<i64: 16, 512>}, {pipeline_mode = #tpu.pipeline_mode<synchronous>, transform_indices = @transform_1, window_bounds = array<i64: 512, 128>}, {pipeline_mode = #tpu.pipeline_mode<synchronous>, transform_indices = @transform_2, window_bounds = array<i64: 1, 128>}, {pipeline_mode = #tpu.pipeline_mode<synchronous>, transform_indices = @transform_3, window_bounds = array<i64: 512, 128>}, {pipeline_mode = #tpu.pipeline_mode<synchronous>, transform_indices = @transform_4, window_bounds = array<i64: 1, 128>}, {transform_indices = @transform_5, window_bounds = array<i64: 16, 128>}, {transform_indices = @transform_6, window_bounds = array<i64: 16, 128>}]} {
    %c0 = arith.constant 0 : index
    %c0_0 = arith.constant 0 : index
    %0 = vector.load %arg1[%c0, %c0_0] : memref<16x512xf32, #tpu.memory_space<vmem>>, vector<16x512xf32>
    %1 = arith.truncf %0 : vector<16x512xf32> to vector<16x512xbf16>
    %c0_1 = arith.constant 0 : index
    %c0_2 = arith.constant 0 : index
    %2 = vector.load %arg2[%c0_1, %c0_2] : memref<512x128xbf16, #tpu.memory_space<vmem>>, vector<512x128xbf16>
    %cst = arith.constant dense<0.000000e+00> : vector<16x128xf32>
    %3 = tpu.matmul %1, %2, %cst {dimension_numbers = #tpu.dot_dimension_numbers<[1], [0], [0], [1], [0, 0, 1, 1], [], []>} : vector<16x512xbf16>, vector<512x128xbf16>, vector<16x128xf32> -> vector<16x128xf32>
    %c0_3 = arith.constant 0 : index
    %c0_4 = arith.constant 0 : index
    %4 = vector.load %arg3[%c0_3, %c0_4] : memref<1x128xf32, #tpu.memory_space<vmem>>, vector<1x128xf32>
    %5 = vector.broadcast %4 : vector<1x128xf32> to vector<16x128xf32>
    %6 = arith.addf %3, %5 : vector<16x128xf32>
    %c0_5 = arith.constant 0 : index
    %c0_6 = arith.constant 0 : index
    %7 = vector.load %arg6[%c0_5, %c0_6] : memref<16x128xf32, #tpu.memory_space<vmem>>, vector<16x128xf32>
    tpu.vector_store %arg6[%c0_5, %c0_6], %6 {strides = array<i32>} : memref<16x128xf32, #tpu.memory_space<vmem>>, vector<16x128xf32>,
    %c0_7 = arith.constant 0 : index
    %c0_8 = arith.constant 0 : index
    %8 = vector.load %arg4[%c0_7, %c0_8] : memref<512x128xbf16, #tpu.memory_space<vmem>>, vector<512x128xbf16>
    %cst_9 = arith.constant dense<0.000000e+00> : vector<16x128xf32>
    %9 = tpu.matmul %1, %8, %cst_9 {dimension_numbers = #tpu.dot_dimension_numbers<[1], [0], [0], [1], [0, 0, 1, 1], [], []>} : vector<16x512xbf16>, vector<512x128xbf16>, vector<16x128xf32> -> vector<16x128xf32>
    %c0_10 = arith.constant 0 : index
    %c0_11 = arith.constant 0 : index
    %10 = vector.load %arg5[%c0_10, %c0_11] : memref<1x128xf32, #tpu.memory_space<vmem>>, vector<1x128xf32>
    %11 = vector.broadcast %10 : vector<1x128xf32> to vector<16x128xf32>
    %12 = arith.addf %9, %11 : vector<16x128xf32>
    %c0_12 = arith.constant 0 : index
    %c0_13 = arith.constant 0 : index
    %13 = vector.load %arg7[%c0_12, %c0_13] : memref<16x128xf32, #tpu.memory_space<vmem>>, vector<16x128xf32>
    tpu.vector_store %arg7[%c0_12, %c0_13], %12 {strides = array<i32>} : memref<16x128xf32, #tpu.memory_space<vmem>>, vector<16x128xf32>,
    return
  }
  func.func @transform_0(%arg0: i32) -> (i32, i32) {
    %c0_i32 = arith.constant 0 : i32
    %c0_i32_0 = arith.constant 0 : i32
    return %arg0, %c0_i32 : i32, i32
  }
  func.func @transform_1(%arg0: i32) -> (i32, i32) {
    %c0_i32 = arith.constant 0 : i32
    %c0_i32_0 = arith.constant 0 : i32
    %c0_i32_1 = arith.constant 0 : i32
    return %c0_i32, %c0_i32_0 : i32, i32
  }
  func.func @transform_2(%arg0: i32) -> (i32, i32) {
    %c0_i32 = arith.constant 0 : i32
    %c0_i32_0 = arith.constant 0 : i32
    %c0_i32_1 = arith.constant 0 : i32
    return %c0_i32, %c0_i32_0 : i32, i32
  }
  func.func @transform_3(%arg0: i32) -> (i32, i32) {
    %c0_i32 = arith.constant 0 : i32
    %c0_i32_0 = arith.constant 0 : i32
    %c0_i32_1 = arith.constant 0 : i32
    return %c0_i32, %c0_i32_0 : i32, i32
  }
  func.func @transform_4(%arg0: i32) -> (i32, i32) {
    %c0_i32 = arith.constant 0 : i32
    %c0_i32_0 = arith.constant 0 : i32
    %c0_i32_1 = arith.constant 0 : i32
    return %c0_i32, %c0_i32_0 : i32, i32
  }
  func.func @transform_5(%arg0: i32) -> (i32, i32) {
    %c0_i32 = arith.constant 0 : i32
    %c0_i32_0 = arith.constant 0 : i32
    return %arg0, %c0_i32 : i32, i32
  }
  func.func @transform_6(%arg0: i32) -> (i32, i32) {
    %c0_i32 = arith.constant 0 : i32
    %c0_i32_0 = arith.constant 0 : i32
    return %arg0, %c0_i32 : i32, i32
  }
}

</mosaic_0001>

<bundles_post_ra>
// kernel: tpu_custom_call.1
= control target key start
LH: loop header
LB: loop body
LE: loop exit
PB: predicated region body
PF: predicated region fallthrough
CT: control target
= control target key end

     0   :  { %12 = vsyncpa [#allocation3], 0  ;;  %s1982_s0 = inlined_call_operand.hbm [shape: f32[48,512], index: 0, kind: input, shape index: {}]   ;;  %s1983_s1 = inlined_call_operand.hbm [shape: bf16[512,128], index: 1, kind: input, shape index: {}]   ;;  %s1984_s2 = inlined_call_operand.vmem [shape: f32[1,128], index: 2, kind: input, shape index: {}]   ;;  %s1985_s3 = inlined_call_operand.hbm [shape: bf16[512,128], index: 3, kind: input, shape index: {}]   ;;  %s1986_s4 = inlined_call_operand.vmem [shape: f32[1,128], index: 4, kind: input, shape index: {}]   ;;  %s1987_s5 = inlined_call_operand.hbm [shape: f32[48,128], index: 5, kind: output, shape index: {0}]   ;;  %s1988_s6 = inlined_call_operand.hbm [shape: f32[48,128], index: 6, kind: output, shape index: {1}]  }
   0x1   :  { %14 = vsyncpa [#allocation3 + $0x1], 0 }
   0x2   :  { %15 = vsyncpa [#allocation6], 0 }
   0x3   :  { %16 = vsyncpa [#allocation4], 0 }
   0x4   :  { %18 = vsyncpa [#allocation4 + $0x1], 0 }
   0x5   :  { %19 = vsyncpa [#allocation10], 0 }
   0x6   :  { %21 = vsyncpa [#allocation10 + $0x1], 0  ;;  %s1729_s21 = smov 0   ;;  %s1731_s22 = smov 0  }
   0x7   :  { %s1733_s23 = smov 0   ;;  %s1735_s24 = smov 0  }
   0x8 LB: > { %s1750_s25 = sadd.s32 4294967295, %s1681_s24   ;;  %s1180_s26 = sadd.s32 4294967294, %s1681_s24   ;;  %s1681_s24 = sphi %s1735_s24, %s2009_s24   ;;  %s1677_s23 = sphi %s1733_s23, %s2008_s23   ;;  %s1673_s22 = sphi %s1731_s22, %s2007_s22   ;;  %s1669_s21 = sphi %s1729_s21, %s2006_s21  }
   0x9   : > { %p47_p0 = scmp.ne.s32.totalorder %s1673_s22, %s1669_s21  ;;  %p1989_p1 = scmp.eq.s32.totalorder %s1750_s25, 0 }
   0xa   : > { %p161_p3 = scmp.eq.s32.totalorder %s1180_s26, 2  ;;  %p1181_p5 = scmp.ge.s32.totalorder %s1681_s24, 1 }
   0xb   : > { %p1759_p4 = por %p1989_p1, %p47_p0  ;;  %p194_p7 = scmp.lt.s32.totalorder %s1681_s24, 4 }
   0xc   : > { %p1764_p6 = por %p161_p3, %p47_p0  ;;  %s1683_s30 = smov [#allocation5]  }
   0xd   : > { %s1993_s27 = scalar_select %p1759_p4, 1, 0 }
   0xe   : > { %s1994_s28 = scalar_select %p1764_p6, 1, 0 }
   0xf   : > { %p1769_p8 = pnand %p1181_p5, %p194_p7  ;;  %s206_s7 = sshll.u32 %s1683_s30, 4  ;;  %s207_s7 = int_to_ptr.vmem [resolvable:$true] %s206_s7 }
  0x10   : > { %s1684_s9 = smov [#allocation7]   ;;  %s1514_s11 = scalar_lea.vmem %s207_s7, 4096 }
  0x11   : > { %s1995_s29 = scalar_select %p1769_p8, 1, 0 }
  0x12   : > { %p1375_p9 = pneg %p1769_p8  ;;  %s222_s10 = sshll.u32 %s1684_s9, 4  ;;  %s223_s10 = int_to_ptr.vmem [resolvable:$true] %s222_s10 }
  0x13   : > { %p1515_p12 = scmp.ne.s32.totalorder %s207_s7, %s1514_s11  ;;  %p1522_p3 = scmp.lt.s32.totalorder %s207_s7, %s207_s7 }
  0x14   : > { %p1777_p10 = pnand %p1375_p9, %p1989_p1  ;;  %p1523_p5 = scmp.lt.s32.totalorder %s1514_s11, %s1514_s11 }
  0x16   : > { %p1505_p11 = pneg %p1777_p10  ;;  %p1524_p7 = por %p1523_p5, %p1522_p3 }
  0x18   : > { %p1517_p13 = pnand %p1515_p12, %p1505_p11 }
  0x1a   : > { %p1518_p0 = pneg %p1517_p13 }
  0x1c   : > { %p1525_p9 = pnand %p1524_p7, %p1518_p0 }
  0x1e   : > { %1528 = shalt.err (!%p1525_p9)
}
  0x1f   : > { %s1685_s12 = smov 64   ;;  %s1686_s13 = smov 4  }
  0x20   : > { %1378 = dma.hbm_to_vmem [thread:$0]  (!%p1777_p10), %s1983_s1, 4096, %s207_s7, [#allocation6], %s1685_s12, %s1685_s12, %s1686_s13  }
  0x21   : > { %s1540_s16 = scalar_lea.vmem %s223_s10, 4096  ;;  %p1548_p2 = scmp.lt.s32.totalorder %s223_s10, %s223_s10 }
  0x22   : > { %p1541_p1 = scmp.ne.s32.totalorder %s223_s10, %s1540_s16  ;;  %p1549_p6 = scmp.lt.s32.totalorder %s1540_s16, %s1540_s16 }
  0x24   : > { %p1543_p12 = pnand %p1541_p1, %p1505_p11  ;;  %p1550_p3 = por %p1549_p6, %p1548_p2 }
  0x26   : > { %p1544_p13 = pneg %p1543_p12 }
  0x28   : > { %p1551_p0 = pnand %p1550_p3, %p1544_p13 }
  0x2a   : > { %1554 = shalt.err (!%p1551_p0)
}
  0x2b   : > { %1381 = dma.hbm_to_vmem [thread:$0]  (!%p1777_p10), %s1985_s3, 4096, %s223_s10, [#allocation6], %s1685_s12, %s1685_s12, %s1686_s13  }
  0x2c   : > { %s1800_s19 = sadd.s32 1, %s1681_s24   ;;  %s34_s20 = sadd.s32 1, %s1677_s23 }
  0x2d   : > { %s31_s26 = ssub.s32 %s1681_s24, %s1800_s19  ;;  %p41_p1 = scmp.ne.s32.totalorder %s1677_s23, %s1673_s22 }
  0x2e   : > { %p32_p2 = scmp.eq.s32.totalorder %s31_s26, 0  ;;  %p42_p6 = scmp.eq.s32.totalorder %s1681_s24, 0 }
  0x2f   : > { %p1997_p11 = scmp.eq.s32.totalorder %s1750_s25, 2  ;;  %p1395_p7 = scmp.lt.s32.totalorder %s1681_s24, 3 }
  0x30   : > { %s1816_s7 = scalar_select %p32_p2, %s1677_s23, %s34_s20  }
  0x31   : > { %p1810_p5 = por %p1997_p11, %p41_p1  ;;  %p43_p9 = por %p42_p6, %p41_p1 }
  0x32   : > { %s239_s8 = sand.u32 1, %s1677_s23   ;;  %s1270_s10 = sshll.u32 %s1681_s24, 10 }
  0x33   : > { %s1998_s30 = scalar_select %p1810_p5, 1, 0 }
  0x34   : > { %s1185_s9 = sshll.u32 %s239_s8, 6  ;;  %s1823_s13 = scalar_lea.hbm %s1982_s0, %s1270_s10 }
  0x35   : > { %s243_s14 = scalar_lea.vmem [#allocation2], %s1185_s9  ;;  %p1827_p10 = pnand %p1395_p7, %p43_p9 }
  0x36   : > { %s251_s15 = sshll.u32 %s243_s14, 4  ;;  %s1831_s17 = scalar_lea.sflag [#allocation3], %s239_s8  ;;  %s1825_s15 = int_to_ptr.vmem [resolvable:$true] %s251_s15 }
  0x37   : > { %s1555_s18 = scalar_lea.hbm %s1823_s13, 1024  ;;  %p1557_p13 = pneg %p1827_p10 }
  0x38   : > { %p1556_p12 = scmp.ne.s32.totalorder %s1823_s13, %s1555_s18  ;;  %s1560_s9 = scalar_lea.hbm %s1982_s0, 3072 }
  0x39   : > { %p1561_p1 = scmp.lt.s32.totalorder %s1823_s13, %s1982_s0  ;;  %p1562_p2 = scmp.lt.s32.totalorder %s1560_s9, %s1555_s18 }
  0x3a   : > { %p1558_p3 = pnand %p1557_p13, %p1556_p12 }
  0x3b   : > { %p1563_p6 = por %p1562_p2, %p1561_p1 }
  0x3c   : > { %p1559_p0 = pneg %p1558_p3 }
  0x3e   : > { %p1564_p11 = pnand %p1563_p6, %p1559_p0 }
  0x40   : > { %1567 = shalt.err (!%p1564_p11)
}
  0x41   : > { %s1568_s8 = scalar_lea.vmem %s1825_s15, 1024  ;;  %s1687_s12 = smov [#allocation2]  }
  0x42   : > { %p1569_p7 = scmp.ne.s32.totalorder %s1825_s15, %s1568_s8  ;;  %s1573_s14 = sshll.u32 %s1687_s12, 4  ;;  %s1574_s14 = int_to_ptr.vmem [resolvable:$false] %s1573_s14 }
  0x43   : > { %s1575_s20 = scalar_lea.vmem %s1574_s14, 2048  ;;  %p1576_p3 = scmp.lt.s32.totalorder %s1825_s15, %s1574_s14 }
  0x44   : > { %p1571_p9 = pnand %p1569_p7, %p1557_p13  ;;  %p1577_p5 = scmp.lt.s32.totalorder %s1575_s20, %s1568_s8 }
  0x46   : > { %p1572_p12 = pneg %p1571_p9  ;;  %p1578_p4 = por %p1577_p5, %p1576_p3 }
  0x48   : > { %p1579_p8 = pnand %p1578_p4, %p1572_p12 }
  0x4a   : > { %1582 = shalt.err (!%p1579_p8)
}
  0x4b   : > { %s1688_s18 = smov 512   ;;  %s1689_s26 = smov 32  }
  0x4c   : > { %1385 = dma.hbm_to_vmem [thread:$0]  (!%p1827_p10), %s1823_s13, 1024, %s1825_s15, %s1831_s17, %s1688_s18, %s1688_s18, %s1689_s26  }
  0x4d   : > { %p2000_p13 = scmp.ne.s32.totalorder %s1995_s29, 0 }
  0x4e   : > { %s1855_s9 = sand.u32 (!%p2000_p13), 1, %s1673_s22   ;;  %p2001_p4 = scmp.ne.s32.totalorder (!%p2000_p13), %s1993_s27, 0 }
  0x4f   : > { %263 = sbr.rel (%p2000_p13) target bundleno = 373 (0x175), region = 40  ;;  %s1190_s10 = sshll.u32 (!%p2000_p13), %s1855_s9, 6 }
  0x50   : > { %s266_s11 = scalar_lea.sflag (!%p2000_p13), [#allocation3], %s1855_s9  ;;  %s1859_s8 = scalar_lea.vmem (!%p2000_p13), [#allocation2], %s1190_s10 }
  0x54   : > { %1652 = dma.done.wait (%p2001_p4), %s266_s11, 1024  }
  0x55   : > { %1654 = vsyncadd (%p2001_p4), %s266_s11, 4294966272  ;;  %p2002_p8 = scmp.eq.s32.totalorder %s1750_s25, 0 }
  0x57   : > { %1656 = dma.done.wait (%p2002_p8), [#allocation6], 8192   ;;  %p2003_p5 = pmov %p2002_p8 }
  0x58   : > { %v1439_v0 = vld [vmem:[#allocation5 + $0x78] sm:$0xff]   ;;  %v1443_v4 = vld [vmem:[#allocation5 + $0x70] sm:$0xff]   ;;  %v1447_v8 = vld [vmem:[#allocation5 + $0x68] sm:$0xff]   ;;  %s1193_s13 = sshll.u32 %s1855_s9, 4  ;;  %s1271_s17 = sshll.u32 %s1750_s25, 8 }
  0x59   : > { %1658 = vsyncadd (%p2003_p5), [#allocation6], 4294959104  ;;  %v1440_v1 = vld [vmem:[#allocation5 + $0xf8] sm:$0xff]   ;;  %1273 = vmatprep.subr.bf16.mxu0 %v1439_v0  ;;  %v1444_v5 = vld [vmem:[#allocation5 + $0xf0] sm:$0xff]   ;;  %s303_s15 = scalar_lea.vmem [#allocation8], %s1193_s13  ;;  %s1899_s20 = scalar_lea.hbm %s1987_s5, %s1271_s17 }
  0x5a   : > { %v1441_v2 = vld [vmem:[#allocation5 + $0x38] sm:$0xff]   ;;  %1295 = vmatprep.subr.bf16.mxu1 %v1440_v1  ;;  %v1445_v6 = vld [vmem:[#allocation5 + $0x30] sm:$0xff]   ;;  %v1448_v9 = vld [vmem:[#allocation5 + $0xe8] sm:$0xff]   ;;  %s1040_s16 = sshll.u32 %s303_s15, 4  ;;  %s1022_s18 = scalar_lea.sflag [#allocation4], %s1855_s9  ;;  %s1892_s16 = int_to_ptr.vmem [resolvable:$true] %s1040_s16 }
  0x5b   : > { %v1442_v3 = vld [vmem:[#allocation5 + $0xb8] sm:$0xff]   ;;  %1274 = vmatpush3.bf16.msra.mxu0 %v1441_v2  ;;  %v1446_v7 = vld [vmem:[#allocation5 + $0xb0] sm:$0xff]   ;;  %v1449_v10 = vld [vmem:[#allocation5 + $0x28] sm:$0xff]   ;;  %s1583_s26 = scalar_lea.vmem %s1892_s16, 256  ;;  %p2004_p0 = scmp.ne.s32.totalorder %s1998_s30, 0 }
  0x5c   : > { %1296 = vmatpush3.bf16.msra.mxu1 %v1442_v3  ;;  %1275 = vmatprep.subr.bf16.mxu0 %v1443_v4  ;;  %v1450_v11 = vld [vmem:[#allocation5 + $0xa8] sm:$0xff]   ;;  %v1451_v12 = vld [vmem:[#allocation5 + $0x60] sm:$0xff]   ;;  %v1455_v16 = vld [vmem:[#allocation5 + $0x58] sm:$0xff]   ;;  %p1584_p10 = scmp.ne.s32.totalorder %s1892_s16, %s1583_s26  ;;  %s1690_s10 = smov [#allocation8]  }
  0x5d   : > { %1297 = vmatprep.subr.bf16.mxu1 %v1444_v5  ;;  %v1452_v13 = vld [vmem:[#allocation5 + $0xe0] sm:$0xff]   ;;  %v1456_v17 = vld [vmem:[#allocation5 + $0xd8] sm:$0xff]   ;;  %v1459_v20 = vld [vmem:[#allocation5 + $0x50] sm:$0xff]   ;;  %s1587_s11 = sshll.u32 %s1690_s10, 4  ;;  %s1588_s11 = int_to_ptr.vmem [resolvable:$false] %s1587_s11 }
  0x5e   : > { %v1453_v14 = vld [vmem:[#allocation5 + $0x20] sm:$0xff]   ;;  %v1457_v18 = vld [vmem:[#allocation5 + $0x18] sm:$0xff]   ;;  %v1460_v21 = vld [vmem:[#allocation5 + $0xd0] sm:$0xff]   ;;  %p1585_p1 = pnand %p1584_p10, %p2004_p0  ;;  %p1590_p6 = scmp.lt.s32.totalorder %s1892_s16, %s1588_s11 }
  0x5f   : > { %1276 = vmatpush3.bf16.msra.mxu0 %v1445_v6  ;;  %v1454_v15 = vld [vmem:[#allocation5 + $0xa0] sm:$0xff]   ;;  %v1458_v19 = vld [vmem:[#allocation5 + $0x98] sm:$0xff]   ;;  %v1461_v22 = vld [vmem:[#allocation5 + $0x10] sm:$0xff]  }
  0x60   : > { %1298 = vmatpush3.bf16.msra.mxu1 %v1446_v7  ;;  %1277 = vmatprep.subr.bf16.mxu0 %v1447_v8  ;;  %v1462_v23 = vld [vmem:[#allocation5 + $0x90] sm:$0xff]   ;;  %v1463_v24 = vld [vmem:[#allocation5 + $0x48] sm:$0xff]   ;;  %v1467_v28 = vld [vmem:[#allocation5 + $0x40] sm:$0xff]   ;;  %p1586_p2 = pneg %p1585_p1 }
  0x61   : > { %1299 = vmatprep.subr.bf16.mxu1 %v1448_v9  ;;  %v1464_v25 = vld [vmem:[#allocation5 + $0xc8] sm:$0xff]   ;;  %v1468_v29 = vld [vmem:[#allocation5 + $0xc0] sm:$0xff]   ;;  %v318_v34 = vld [vmem:[%s1859_s8 + $0x18] sm:$0xff] }
  0x62   : > { %v1465_v26 = vld [vmem:[#allocation5 + $0x8] sm:$0xff]   ;;  %v1469_v30 = vld [vmem:[#allocation5] sm:$0xff]   ;;  %v322_v36 = vld [vmem:[%s1859_s8 + $0x38] sm:$0xff] }
  0x63   : > { %1278 = vmatpush3.bf16.msra.mxu0 %v1449_v10  ;;  %v1466_v27 = vld [vmem:[#allocation5 + $0x88] sm:$0xff]   ;;  %v1470_v31 = vld [vmem:[#allocation5 + $0x80] sm:$0xff]   ;;  %v326_v39 = vpack.c.bf16 %v322_v36, %v318_v34  ;;  %v317_v41 = vld [vmem:[%s1859_s8 + $0x10] sm:$0xff] }
  0x64   : > { %1300 = vmatpush3.bf16.msra.mxu1 %v1450_v11  ;;  %1279 = vmatprep.subr.bf16.mxu0 %v1451_v12  ;;  %v316_v32 = vld [vmem:[%s1859_s8 + $0x8] sm:$0xff]  ;;  %v315_v37 = vld [vmem:[%s1859_s8] sm:$0xff]  ;;  %v321_v42 = vld [vmem:[%s1859_s8 + $0x30] sm:$0xff] }
  0x65   : > { %1301 = vmatprep.subr.bf16.mxu1 %v1452_v13  ;;  %v320_v33 = vld [vmem:[%s1859_s8 + $0x28] sm:$0xff]  ;;  %v319_v38 = vld [vmem:[%s1859_s8 + $0x20] sm:$0xff]  ;;  %v1879_v43 = vpack.c.bf16 %v321_v42, %v317_v41  ;;  %v1471_v44 = vld [vmem:[#allocation7 + $0x78] sm:$0xff]   ;;  %663 = vmatprep.mubr.bf16.mxu1 %v326_v39  ;;  %s1589_s8 = scalar_lea.vmem %s1588_s11, 512 }
  0x66   : > { %v324_v35 = vpack.c.bf16 %v320_v33, %v316_v32  ;;  %v1875_v40 = vpack.c.bf16 %v319_v38, %v315_v37  ;;  %v1472_v45 = vld [vmem:[#allocation7 + $0xf8] sm:$0xff]   ;;  %v1475_v48 = vld [vmem:[#allocation7 + $0x70] sm:$0xff]   ;;  %v1479_v52 = vld [vmem:[#allocation7 + $0x68] sm:$0xff]   ;;  %p1591_p11 = scmp.lt.s32.totalorder %s1589_s8, %s1583_s26 }
  0x67   : > { %1280 = vmatpush3.bf16.msra.mxu0 %v1453_v14  ;;  %v1473_v46 = vld [vmem:[#allocation7 + $0x38] sm:$0xff]   ;;  %v1476_v49 = vld [vmem:[#allocation7 + $0xf0] sm:$0xff]   ;;  %v1480_v53 = vld [vmem:[#allocation7 + $0xe8] sm:$0xff]  }
  0x68   : > { %1302 = vmatpush3.bf16.msra.mxu1 %v1454_v15  ;;  %1281 = vmatprep.subr.bf16.mxu0 %v1455_v16  ;;  %v1474_v47 = vld [vmem:[#allocation7 + $0xb8] sm:$0xff]   ;;  %v1477_v50 = vld [vmem:[#allocation7 + $0x30] sm:$0xff]   ;;  %v1481_v54 = vld [vmem:[#allocation7 + $0x28] sm:$0xff]   ;;  %p1592_p7 = por %p1591_p11, %p1590_p6 }
  0x69   : > { %1303 = vmatprep.subr.bf16.mxu1 %v1456_v17  ;;  %622 = vmatprep.mubr.bf16.mxu0 %v324_v35  ;;  %v1478_v51 = vld [vmem:[#allocation7 + $0xb0] sm:$0xff]   ;;  %v1482_v55 = vld [vmem:[#allocation7 + $0xa8] sm:$0xff]   ;;  %v1483_v56 = vld [vmem:[#allocation7 + $0x60] sm:$0xff]  }
  0x6a   : > { %v1484_v57 = vld [vmem:[#allocation7 + $0xe0] sm:$0xff]   ;;  %v1487_v60 = vld [vmem:[#allocation7 + $0x58] sm:$0xff]   ;;  %v1491_v0 = vld [vmem:[#allocation7 + $0x50] sm:$0xff]   ;;  %p1593_p9 = pnand %p1592_p7, %p1586_p2 }
  0x6b   : > { %1282 = vmatpush3.bf16.msra.mxu0 %v1457_v18  ;;  %v1485_v58 = vld [vmem:[#allocation7 + $0x20] sm:$0xff]   ;;  %v1488_v61 = vld [vmem:[#allocation7 + $0xd8] sm:$0xff]   ;;  %v1492_v1 = vld [vmem:[#allocation7 + $0xd0] sm:$0xff]  }
  0x6c   : > { %1304 = vmatpush3.bf16.msra.mxu1 %v1458_v19  ;;  %1283 = vmatprep.subr.bf16.mxu0 %v1459_v20  ;;  %v1486_v59 = vld [vmem:[#allocation7 + $0xa0] sm:$0xff]   ;;  %v1489_v62 = vld [vmem:[#allocation7 + $0x18] sm:$0xff]   ;;  %v1493_v2 = vld [vmem:[#allocation7 + $0x10] sm:$0xff]  }
  0x6d   : > { %1305 = vmatprep.subr.bf16.mxu1 %v1460_v21  ;;  %v1490_v63 = vld [vmem:[#allocation7 + $0x98] sm:$0xff]   ;;  %v1494_v3 = vld [vmem:[#allocation7 + $0x90] sm:$0xff]   ;;  %v1495_v4 = vld [vmem:[#allocation7 + $0x48] sm:$0xff]  }
  0x6e   : > { %v1496_v5 = vld [vmem:[#allocation7 + $0xc8] sm:$0xff]   ;;  %v1499_v8 = vld [vmem:[#allocation7 + $0x40] sm:$0xff]  }
  0x6f   : > { %1284 = vmatpush3.bf16.msra.mxu0 %v1461_v22  ;;  %v1497_v6 = vld [vmem:[#allocation7 + $0x8] sm:$0xff]   ;;  %v1500_v9 = vld [vmem:[#allocation7 + $0xc0] sm:$0xff]  }
  0x70   : > { %1306 = vmatpush3.bf16.msra.mxu1 %v1462_v23  ;;  %1285 = vmatprep.subr.bf16.mxu0 %v1463_v24  ;;  %v1498_v7 = vld [vmem:[#allocation7 + $0x88] sm:$0xff]   ;;  %v1501_v10 = vld [vmem:[#allocation7] sm:$0xff]  }
  0x71   : > { %1307 = vmatprep.subr.bf16.mxu1 %v1464_v25  ;;  %v1502_v11 = vld [vmem:[#allocation7 + $0x80] sm:$0xff]  }
  0x72   : > { %v1195_v14 = vld [vmem:[%s1984_s2] ss:$0 sm:$0xff] }
  0x73   : > { %1286 = vmatpush3.bf16.msra.mxu0 %v1465_v26 }
  0x74   : > { %1308 = vmatpush3.bf16.msra.mxu1 %v1466_v27  ;;  %1287 = vmatprep.subr.bf16.mxu0 %v1467_v28 }
  0x75   : > { %1309 = vmatprep.subr.bf16.mxu1 %v1468_v29 }
  0x77   : > { %1288 = vmatpush3.bf16.msra.mxu0 %v1469_v30 }
  0x78   : > { %1310 = vmatpush3.bf16.msra.mxu1 %v1470_v31  ;;  %1317 = vmatprep.subr.bf16.mxu0 %v1471_v44 }
  0x79   : > { %1339 = vmatprep.subr.bf16.mxu1 %v1472_v45 }
  0x7a   : > { %623 = vmatmul.mubr.bf16.vlgmr.msra.gmra.mxu0 %v1875_v40 }
  0x7b   : > { %664 = vmatmul.mubr.bf16.vlgmr.msra.gmra.mxu1 %v1879_v43  ;;  %969 = vmatprep.mubr.bf16.mxu0 %v324_v35 }
  0x7c   : > { %1318 = vmatpush3.bf16.msra.mxu0 %v1473_v46  ;;  %1010 = vmatprep.mubr.bf16.mxu1 %v326_v39 }
  0x7d   : > { %1340 = vmatpush3.bf16.msra.mxu1 %v1474_v47  ;;  %1319 = vmatprep.subr.bf16.mxu0 %v1475_v48 }
  0x7e   : > { %1341 = vmatprep.subr.bf16.mxu1 %v1476_v49 }
  0x80   : > { %1320 = vmatpush3.bf16.msra.mxu0 %v1477_v50 }
  0x81   : > { %1342 = vmatpush3.bf16.msra.mxu1 %v1478_v51  ;;  %1321 = vmatprep.subr.bf16.mxu0 %v1479_v52 }
  0x82   : > { %1343 = vmatprep.subr.bf16.mxu1 %v1480_v53 }
  0x84   : > { %1322 = vmatpush3.bf16.msra.mxu0 %v1481_v54 }
  0x85   : > { %1344 = vmatpush3.bf16.msra.mxu1 %v1482_v55  ;;  %1323 = vmatprep.subr.bf16.mxu0 %v1483_v56 }
  0x86   : > { %1345 = vmatprep.subr.bf16.mxu1 %v1484_v57 }
  0x88   : > { %1324 = vmatpush3.bf16.msra.mxu0 %v1485_v58 }
  0x89   : > { %1346 = vmatpush3.bf16.msra.mxu1 %v1486_v59  ;;  %1325 = vmatprep.subr.bf16.mxu0 %v1487_v60 }
  0x8a   : > { %1347 = vmatprep.subr.bf16.mxu1 %v1488_v61 }
  0x8c   : > { %1326 = vmatpush3.bf16.msra.mxu0 %v1489_v62 }
  0x8d   : > { %1348 = vmatpush3.bf16.msra.mxu1 %v1490_v63  ;;  %1327 = vmatprep.subr.bf16.mxu0 %v1491_v0 }
  0x8e   : > { %1349 = vmatprep.subr.bf16.mxu1 %v1492_v1 }
  0x90   : > { %1328 = vmatpush3.bf16.msra.mxu0 %v1493_v2 }
  0x91   : > { %1350 = vmatpush3.bf16.msra.mxu1 %v1494_v3  ;;  %1329 = vmatprep.subr.bf16.mxu0 %v1495_v4 }
  0x92   : > { %1351 = vmatprep.subr.bf16.mxu1 %v1496_v5 }
  0x94   : > { %1330 = vmatpush3.bf16.msra.mxu0 %v1497_v6 }
  0x95   : > { %1352 = vmatpush3.bf16.msra.mxu1 %v1498_v7  ;;  %1331 = vmatprep.subr.bf16.mxu0 %v1499_v8 }
  0x96   : > { %1353 = vmatprep.subr.bf16.mxu1 %v1500_v9 }
  0x98   : > { %1332 = vmatpush3.bf16.msra.mxu0 %v1501_v10 }
  0x99   : > { %1354 = vmatpush3.bf16.msra.mxu1 %v1502_v11 }
  0x9b   : > { %970 = vmatmul.mubr.bf16.vlgmr.msra.gmra.mxu0 %v1875_v40 }
  0x9c   : > { %1011 = vmatmul.mubr.bf16.vlgmr.msra.gmra.mxu1 %v1879_v43 }
 0x13a   : > { %v1289_v12 = vpop.f32.mrf.mxu0 }
 0x13b   : > { %v1311_v13 = vpop.f32.mrf.mxu1 }
 0x13c   : > { %v1290_v15 = vpop.f32.mrf.mxu0 }
 0x13d   : > { %v1291_v16 = vadd.f32 %v1290_v15, %v1289_v12  ;;  %v1312_v17 = vpop.f32.mrf.mxu1 }
 0x13e   : > { %v1313_v18 = vadd.f32 %v1312_v17, %v1311_v13  ;;  %v1292_v19 = vpop.f32.mrf.mxu0 }
 0x13f   : > { %v625_v20 = vadd.f32 %v1291_v16, %v1195_v14  ;;  %v1314_v21 = vpop.f32.mrf.mxu1 }
 0x140   : > { %v1293_v22 = vpop.f32.mrf.mxu0 }
 0x141   : > { %v666_v23 = vadd.f32 %v1313_v18, %v625_v20  ;;  %v1294_v24 = vadd.f32 %v1293_v22, %v1292_v19  ;;  %v1315_v25 = vpop.f32.mrf.mxu1 }
 0x142   : > { %v1316_v27 = vadd.f32 %v1315_v25, %v1314_v21 }
 0x143   : > { %672 = vst [vmem:[%s303_s15] sm:$0xff] %v666_v23  ;;  %v628_v26 = vadd.f32 %v1294_v24, %v1195_v14 }
 0x145   : > { %v669_v28 = vadd.f32 %v1316_v27, %v628_v26 }
 0x147   : > { %673 = vst [vmem:[%s303_s15 + $0x8] sm:$0xff] %v669_v28 }
 0x148   : > { %1596 = shalt.err (!%p1593_p9)
}
 0x149   : > { %s1597_s27 = scalar_lea.hbm %s1899_s20, 256  ;;  %s1601_s12 = scalar_lea.hbm %s1987_s5, 768 }
 0x14a   : > { %p1598_p12 = scmp.ne.s32.totalorder %s1899_s20, %s1597_s27  ;;  %p1602_p4 = scmp.lt.s32.totalorder %s1899_s20, %s1987_s5 }
 0x14b   : > { %p1603_p8 = scmp.lt.s32.totalorder %s1601_s12, %s1597_s27 }
 0x14c   : > { %p1599_p3 = pnand %p1598_p12, %p2004_p0 }
 0x14d   : > { %p1604_p5 = por %p1603_p8, %p1602_p4 }
 0x14e   : > { %p1600_p13 = pneg %p1599_p3 }
 0x150   : > { %p1605_p10 = pnand %p1604_p5, %p1600_p13 }
 0x152   : > { %1608 = shalt.err (!%p1605_p10)
}
 0x153   : > { %s1691_s26 = smov 128   ;;  %s1692_s11 = smov 8   ;;  %v1228_v31 = vld [vmem:[%s1986_s4] ss:$0 sm:$0xff] }
 0x154   : > { %1371 = dma.vmem_to_hbm [thread:$0]  (%p2004_p0), %s1892_s16, 256, %s1899_s20, %s1022_s18, %s1691_s26, %s1691_s26, %s1692_s11  }
 0x155   : > { %s310_s16 = scalar_lea.vmem [#allocation9], %s1193_s13  ;;  %s1939_s15 = scalar_lea.hbm %s1988_s6, %s1271_s17 }
 0x156   : > { %s1056_s20 = sshll.u32 %s310_s16, 4  ;;  %s1027_s13 = scalar_lea.sflag [#allocation10], %s1855_s9  ;;  %s1932_s20 = int_to_ptr.vmem [resolvable:$true] %s1056_s20 }
 0x157   : > { %s1609_s12 = scalar_lea.vmem %s1932_s20, 256  ;;  %s1693_s14 = smov [#allocation9]  }
 0x158   : > { %p1610_p1 = scmp.ne.s32.totalorder %s1932_s20, %s1609_s12  ;;  %s1613_s10 = sshll.u32 %s1693_s14, 4  ;;  %s1614_s10 = int_to_ptr.vmem [resolvable:$false] %s1613_s10 }
 0x159   : > { %s1615_s8 = scalar_lea.vmem %s1614_s10, 512  ;;  %p1616_p11 = scmp.lt.s32.totalorder %s1932_s20, %s1614_s10 }
 0x15a   : > { %p1611_p2 = pnand %p1610_p1, %p2004_p0  ;;  %p1617_p7 = scmp.lt.s32.totalorder %s1615_s8, %s1609_s12 }
 0x15b   : > { %v1333_v29 = vpop.f32.mrf.mxu0 }
 0x15c   : > { %v1355_v30 = vpop.f32.mrf.mxu1  ;;  %p1612_p6 = pneg %p1611_p2  ;;  %p1618_p9 = por %p1617_p7, %p1616_p11 }
 0x15d   : > { %v1334_v32 = vpop.f32.mrf.mxu0 }
 0x15e   : > { %v1335_v33 = vadd.f32 %v1334_v32, %v1333_v29  ;;  %v1356_v34 = vpop.f32.mrf.mxu1  ;;  %p1619_p12 = pnand %p1618_p9, %p1612_p6 }
 0x15f   : > { %v1336_v35 = vpop.f32.mrf.mxu0  ;;  %v1357_v37 = vadd.f32 %v1356_v34, %v1355_v30 }
 0x160   : > { %v972_v36 = vadd.f32 %v1335_v33, %v1228_v31  ;;  %v1358_v38 = vpop.f32.mrf.mxu1 }
 0x161   : > { %v1337_v39 = vpop.f32.mrf.mxu0 }
 0x162   : > { %v1013_v40 = vadd.f32 %v1357_v37, %v972_v36  ;;  %v1338_v41 = vadd.f32 %v1337_v39, %v1336_v35  ;;  %v1359_v42 = vpop.f32.mrf.mxu1 }
 0x163   : > { %v1360_v44 = vadd.f32 %v1359_v42, %v1358_v38 }
 0x164   : > { %1019 = vst [vmem:[%s310_s16] sm:$0xff] %v1013_v40  ;;  %v975_v43 = vadd.f32 %v1338_v41, %v1228_v31 }
 0x166   : > { %v1016_v45 = vadd.f32 %v1360_v44, %v975_v43 }
 0x168   : > { %1020 = vst [vmem:[%s310_s16 + $0x8] sm:$0xff] %v1016_v45 }
 0x169   : > { %1622 = shalt.err (!%p1619_p12)
}
 0x16a   : > { %s1623_s25 = scalar_lea.hbm %s1939_s15, 256  ;;  %s1627_s27 = scalar_lea.hbm %s1988_s6, 768 }
 0x16b   : > { %p1624_p3 = scmp.ne.s32.totalorder %s1939_s15, %s1623_s25  ;;  %p1628_p8 = scmp.lt.s32.totalorder %s1939_s15, %s1988_s6 }
 0x16c   : > { %p1629_p5 = scmp.lt.s32.totalorder %s1627_s27, %s1623_s25 }
 0x16d   : > { %p1625_p13 = pnand %p1624_p3, %p2004_p0 }
 0x16e   : > { %p1630_p10 = por %p1629_p5, %p1628_p8 }
 0x16f   : > { %p1626_p4 = pneg %p1625_p13 }
 0x171   : > { %p1631_p1 = pnand %p1630_p10, %p1626_p4 }
 0x173   : > { %1634 = shalt.err (!%p1631_p1)
}
 0x174   : > { %1372 = dma.vmem_to_hbm [thread:$0]  (%p2004_p0), %s1932_s20, 256, %s1939_s15, %s1027_s13, %s1691_s26, %s1691_s26, %s1692_s11  }
 0x175 PF: > { %p1398_p2 = scmp.ge.s32.totalorder %s1681_s24, 2  ;;  %s1071_s29 = sand.u32 1, %s1669_s21  }
 0x176   : > { %p2005_p6 = scmp.ne.s32.totalorder %s1994_s28, 0  ;;  %s1072_s12 = scalar_lea.sflag [#allocation4], %s1071_s29 }
 0x178   : > { %p1387_p11 = pnand %p1398_p2, %p2005_p6 }
 0x17a   : > { %p1388_p7 = pneg %p1387_p11 }
 0x17c   : > { %1660 = dma.done.wait (%p1388_p7), %s1072_s12, 256  }
 0x17d   : > { %1662 = vsyncadd (%p1388_p7), %s1072_s12, 4294967040  ;;  %s1081_s14 = scalar_lea.sflag [#allocation10], %s1071_s29 }
 0x17e   : > { %1664 = dma.done.wait (%p1388_p7), %s1081_s14, 256  }
 0x17f   : > { %1666 = vsyncadd (%p1388_p7), %s1081_s14, 4294967040  ;;  %p24_p0 = scmp.ge.s32.totalorder %s1800_s19, 5   ;;  %s2006_s21 = smov %s1673_s22 }
 0x180   : > { %s2007_s22 = smov %s1677_s23  ;;  %s2008_s23 = smov %s1816_s7 }
 0x181   : > { %s2009_s24 = smov %s1800_s19  ;;  %26 = sbr.rel (!%p24_p0) target bundleno = 8 (0x8), region = 110 }
 0x186   :  { %1086 = vsyncpa [#allocation3], 1 }
 0x187   :  { %1088 = vsyncpa [#allocation3 + $0x1], 1 }
 0x188   :  { %1089 = vsyncpa [#allocation6], 1 }
 0x189   :  { %1090 = vsyncpa [#allocation4], 1 }
 0x18a   :  { %1092 = vsyncpa [#allocation4 + $0x1], 1 }
 0x18b   :  { %1093 = vsyncpa [#allocation10], 1 }
 0x18c   :  { %1095 = vsyncpa [#allocation10 + $0x1], 1 }

</bundles_post_ra>
